<compile_context>
chip_gen: v7x
topology: tpu7x:2x2x1
jax: 0.10.0
libtpu: 0.0.40
codegen_flags: <defaults>
</compile_context>

<pallas_src>
import jax
import jax.numpy as jnp
from jax.experimental import pallas as pl
from jax.experimental.pallas import tpu as pltpu


# ---------------------------------------------------------------------------
# Kernels
# ---------------------------------------------------------------------------

def _encoder_kernel_single(x_ref, w_ref, vec_ref, o_ref):
    """Whole K in one block: matmul + bias + ReLU + folded BatchNorm affine."""
    acc = jnp.dot(x_ref[...], w_ref[...], preferred_element_type=jnp.float32)
    h = jnp.maximum(acc + vec_ref[0:1, :], 0.0)          # bias + ReLU
    o_ref[...] = (h * vec_ref[1:2, :] + vec_ref[2:3, :]).astype(o_ref.dtype)


def _encoder_kernel_multi_k(x_ref, w_ref, vec_ref, o_ref):
    """Tiled-K variant: accumulate directly into the f32 output block."""
    k = pl.program_id(2)

    @pl.when(k == 0)
    def _():
        # Output block index (i, j) is constant over k -> VMEM-resident.
        # Seed it with the broadcast bias (removes the add from the epilogue).
        o_ref[...] = jnp.broadcast_to(vec_ref[0:1, :], o_ref.shape)

    o_ref[...] += jnp.dot(x_ref[...], w_ref[...],
                          preferred_element_type=jnp.float32)

    @pl.when(k == pl.num_programs(2) - 1)
    def _():
        h = jnp.maximum(o_ref[...], 0.0)                  # ReLU
        o_ref[...] = h * vec_ref[1:2, :] + vec_ref[2:3, :]


# ---------------------------------------------------------------------------
# Helpers
# ---------------------------------------------------------------------------

def _round_up(x, m):
    return (x + m - 1) // m * m


def _largest_divisor_tile(padded, cap, unit):
    """Largest multiple of `unit` that divides `padded` and is <= cap."""
    cap = max(unit, min(cap, padded))
    best = unit
    t = unit
    while t <= cap:
        if padded % t == 0:
            best = t
        t += unit
    return best


def prepare_encoder_params(w_t, b, gamma, beta, running_mean, running_var,
                           *, eps=1e-5, weight_dtype=jnp.bfloat16):
    """One-time weight prep: fold BN, pack per-channel vectors, pad, cast.

    w_t is the PyTorch Linear weight transposed: (d_in, d_out).
    Padding is only to 128 granularity (none when the dim is already < 128),
    so no weight HBM traffic is spent on tile-granular zero padding.
    """
    K, N = w_t.shape

    # Eval-mode BatchNorm folded into per-channel scale / shift.
    scale = (gamma * jax.lax.rsqrt(running_var + eps)).reshape(1, N)
    shift = (beta.reshape(1, N) - running_mean.reshape(1, N) * scale)

    Kp = K if K < 128 else _round_up(K, 128)
    Np = N if N < 128 else _round_up(N, 128)

    w_p = jnp.pad(w_t, ((0, Kp - K), (0, Np - N))).astype(weight_dtype)

    # Pack bias / scale / shift into one (3, Np) operand -> single BlockSpec.
    vec = jnp.concatenate(
        [b.reshape(1, N).astype(jnp.float32),
         scale.astype(jnp.float32),
         shift.astype(jnp.float32)], axis=0)
    vec_p = jnp.pad(vec, ((0, 0), (0, Np - N)))

    return dict(w=w_p, vec=vec_p, K=K, N=N, Kp=Kp, Np=Np)


def encoder_forward(x, params, *, max_tm=256, max_tn=512, max_tk=None,
                    interpret=False):
    """x: (B, d_in) f32.  `params` comes from prepare_encoder_params."""
    B, K = x.shape
    assert K == params["K"], (K, params["K"])
    Kp, Np, N = params["Kp"], params["Np"], params["N"]
    w, vec = params["w"], params["vec"]

    # Activations are cast to the weight dtype only when the weight is bf16.
    x_dtype = jnp.bfloat16 if w.dtype == jnp.bfloat16 else jnp.float32
    m_gran = 16 if x_dtype == jnp.bfloat16 else 8      # bf16 packs 16 sublanes

    # ---- tile selection (divisors of the padded dims, no extra padding) ----
    Mp = _round_up(B, m_gran)
    tm = Mp if Mp <= max_tm else _largest_divisor_tile(Mp, max_tm, m_gran)

    tn = Np if Np < 128 else _largest_divisor_tile(Np, max_tn, 128)

    tk_cap = 2048 if x_dtype == jnp.bfloat16 else 1024
    if max_tk is not None:
        tk_cap = min(tk_cap, max_tk)
    tk = Kp if Kp < 128 else _largest_divisor_tile(Kp, tk_cap, 128)
    if Kp < 128:
        tk = Kp  # full-dim block (< 128 lanes) is legal; avoids K padding

    # ---- activation padding / cast (the only per-call data movement) -------
    if (Mp, Kp) != (B, K):
        x_p = jnp.pad(x, ((0, Mp - B), (0, Kp - K)))
    else:
        x_p = x
    if x_p.dtype != x_dtype:
        x_p = x_p.astype(x_dtype)

    grid_m, grid_n, grid_k = Mp // tm, Np // tn, Kp // tk

    if grid_k == 1:
        grid = (grid_m, grid_n)
        in_specs = [
            pl.BlockSpec((tm, tk), lambda i, j: (i, 0)),   # x
            pl.BlockSpec((tk, tn), lambda i, j: (0, j)),   # W^T
            pl.BlockSpec((3, tn), lambda i, j: (0, j)),    # [bias;scale;shift]
        ]
        out_spec = pl.BlockSpec((tm, tn), lambda i, j: (i, j))
        kernel = _encoder_kernel_single
        dim_sem = ("parallel", "parallel")
    else:
        grid = (grid_m, grid_n, grid_k)
        in_specs = [
            pl.BlockSpec((tm, tk), lambda i, j, k: (i, k)),
            pl.BlockSpec((tk, tn), lambda i, j, k: (k, j)),
            pl.BlockSpec((3, tn), lambda i, j, k: (0, j)),
        ]
        out_spec = pl.BlockSpec((tm, tn), lambda i, j, k: (i, j))
        kernel = _encoder_kernel_multi_k
        dim_sem = ("parallel", "parallel", "arbitrary")

    # VMEM budget: double-buffered inputs + output, with headroom; safely
    # below v7x's 32 MiB scoped default for the capped tile sizes.
    itemsize_x = jnp.dtype(x_dtype).itemsize
    itemsize_w = jnp.dtype(w.dtype).itemsize
    vmem_need = (2 * (tm * tk * itemsize_x + tk * tn * itemsize_w + 3 * tn * 4)
                 + 2 * tm * tn * 4)
    vmem_limit = int(min(32 * 1024 * 1024,
                         max(vmem_need + (4 << 20), 16 << 20)))

    cost = pl.CostEstimate(
        flops=2 * Mp * Np * Kp,
        transcendentals=0,
        bytes_accessed=int(x_p.size * itemsize_x + w.size * itemsize_w
                           + vec.size * 4 + Mp * Np * 4),
    )

    out = pl.pallas_call(
        kernel,
        out_shape=jax.ShapeDtypeStruct((Mp, Np), jnp.float32),
        grid=grid,
        in_specs=in_specs,
        out_specs=out_spec,
        compiler_params=pltpu.CompilerParams(
            dimension_semantics=dim_sem,
            vmem_limit_bytes=vmem_limit),
        cost_estimate=cost,
        interpret=interpret,
    )(x_p, w, vec)

    # Padded batch rows hold relu(b)*scale+shift garbage; sliced off here.
    return out[:B, :N]


# ---------------------------------------------------------------------------
# Parameter init / reference
# ---------------------------------------------------------------------------

def make_params(key, input_dimension, hidden_layer_size):
    """Deterministic init mimicking PyTorch defaults."""
    k_w, k_b = jax.random.split(key)
    bound = 1.0 / jnp.sqrt(jnp.float32(input_dimension))
    # PyTorch Linear weight is (out, in); store transposed (in, out).
    w_t = jax.random.uniform(k_w, (input_dimension, hidden_layer_size),
                             jnp.float32, -bound, bound)
    b = jax.random.uniform(k_b, (1, hidden_layer_size), jnp.float32,
                           -bound, bound)
    # BatchNorm1d defaults: gamma=1, beta=0, running_mean=0, running_var=1.
    gamma = jnp.ones((1, hidden_layer_size), jnp.float32)
    beta = jnp.zeros((1, hidden_layer_size), jnp.float32)
    running_mean = jnp.zeros((1, hidden_layer_size), jnp.float32)
    running_var = jnp.ones((1, hidden_layer_size), jnp.float32)
    return w_t, b, gamma, beta, running_mean, running_var


def encoder_reference(x, w_t, b, gamma, beta, running_mean, running_var,
                      eps=1e-5):
    h = jnp.maximum(x @ w_t + b, 0.0)
    return (h - running_mean) * jax.lax.rsqrt(running_var + eps) * gamma + beta


# ---------------------------------------------------------------------------
# Self-test
# ---------------------------------------------------------------------------

if __name__ == "__main__":
    input_dimension = 64
    hidden_layer_size = 128
    batch = 8

    key = jax.random.PRNGKey(0)
    k_x, k_p, k_x2, k_p2 = jax.random.split(key, 4)
    x = jax.random.normal(k_x, (batch, input_dimension), jnp.float32)
    raw = make_params(k_p, input_dimension, hidden_layer_size)
    ref = encoder_reference(x, *raw)

    # 1) f32 weight path (exact check; single-K kernel, no padding at all).
    prep_f32 = prepare_encoder_params(*raw, weight_dtype=jnp.float32)
    out_f32 = jax.block_until_ready(encoder_forward(x, prep_f32))
    assert out_f32.shape == (batch, hidden_layer_size)
    assert jnp.all(jnp.isfinite(out_f32))
    assert jnp.allclose(out_f32, ref, atol=1e-5, rtol=1e-5)

    # 2) default bf16 operand path (f32 accumulation), relaxed tolerance.
    prep_bf16 = prepare_encoder_params(*raw)   # weight_dtype=bf16 default
    out_bf16 = jax.block_until_ready(encoder_forward(x, prep_bf16))
    assert out_bf16.shape == (batch, hidden_layer_size)
    assert jnp.all(jnp.isfinite(out_bf16))
    assert jnp.allclose(out_bf16, ref, atol=3e-2, rtol=3e-2)

    # 3) multi-K accumulation path: K=256 with tk forced to 128 (2 K-steps).
    x2 = jax.random.normal(k_x2, (16, 256), jnp.float32)
    raw2 = make_params(k_p2, 256, hidden_layer_size)
    prep2 = prepare_encoder_params(*raw2, weight_dtype=jnp.float32)
    out2 = jax.block_until_ready(encoder_forward(x2, prep2, max_tk=128))
    ref2 = encoder_reference(x2, *raw2)
    assert jnp.allclose(out2, ref2, atol=1e-4, rtol=1e-4)

    print("KERNEL_OK")
</pallas_src>

<mosaic_0001>
module attributes {stable_mosaic.version = 11 : i64} {
  func.func @_encoder_kernel_single(%arg0: i32, %arg1: i32, %arg2: memref<8x64xf32, #tpu.memory_space<vmem>>, %arg3: memref<64x128xf32, #tpu.memory_space<vmem>>, %arg4: memref<3x128xf32, #tpu.memory_space<vmem>>, %arg5: memref<8x128xf32, #tpu.memory_space<vmem>>) attributes {dimension_semantics = [#tpu.dimension_semantics<parallel>, #tpu.dimension_semantics<parallel>], iteration_bounds = array<i64: 1, 1>, scalar_prefetch = 0 : i64, scratch_operands = 0 : i64, tpu.core_type = #tpu.core_type<tc>, window_params = [{transform_indices = @transform_0, window_bounds = array<i64: 8, 64>}, {transform_indices = @transform_1, window_bounds = array<i64: 64, 128>}, {transform_indices = @transform_2, window_bounds = array<i64: 3, 128>}, {transform_indices = @transform_3, window_bounds = array<i64: 8, 128>}]} {
    %c0 = arith.constant 0 : index
    %c0_0 = arith.constant 0 : index
    %0 = vector.load %arg2[%c0, %c0_0] : memref<8x64xf32, #tpu.memory_space<vmem>>, vector<8x64xf32>
    %c0_1 = arith.constant 0 : index
    %c0_2 = arith.constant 0 : index
    %1 = vector.load %arg3[%c0_1, %c0_2] : memref<64x128xf32, #tpu.memory_space<vmem>>, vector<64x128xf32>
    %cst = arith.constant dense<0.000000e+00> : vector<8x128xf32>
    %2 = tpu.matmul %0, %1, %cst {dimension_numbers = #tpu.dot_dimension_numbers<[1], [0], [0], [1], [0, 0, 1, 1], [], []>} : vector<8x64xf32>, vector<64x128xf32>, vector<8x128xf32> -> vector<8x128xf32>
    %c0_3 = arith.constant 0 : index
    %c0_4 = arith.constant 0 : index
    %3 = vector.load %arg4[%c0_3, %c0_4] : memref<3x128xf32, #tpu.memory_space<vmem>>, vector<1x128xf32>
    %4 = vector.broadcast %3 : vector<1x128xf32> to vector<8x128xf32>
    %5 = arith.addf %2, %4 : vector<8x128xf32>
    %cst_5 = arith.constant 0.000000e+00 : f32
    %6 = vector.broadcast %cst_5 : f32 to vector<8x128xf32>
    %7 = arith.maximumf %5, %6 : vector<8x128xf32>
    %c1 = arith.constant 1 : index
    %c0_6 = arith.constant 0 : index
    %8 = vector.load %arg4[%c1, %c0_6] : memref<3x128xf32, #tpu.memory_space<vmem>>, vector<1x128xf32>
    %9 = vector.broadcast %8 : vector<1x128xf32> to vector<8x128xf32>
    %10 = arith.mulf %7, %9 : vector<8x128xf32>
    %c2 = arith.constant 2 : index
    %c0_7 = arith.constant 0 : index
    %11 = vector.load %arg4[%c2, %c0_7] : memref<3x128xf32, #tpu.memory_space<vmem>>, vector<1x128xf32>
    %12 = vector.broadcast %11 : vector<1x128xf32> to vector<8x128xf32>
    %13 = arith.addf %10, %12 : vector<8x128xf32>
    %c0_8 = arith.constant 0 : index
    %c0_9 = arith.constant 0 : index
    %14 = vector.load %arg5[%c0_8, %c0_9] : memref<8x128xf32, #tpu.memory_space<vmem>>, vector<8x128xf32>
    tpu.vector_store %arg5[%c0_8, %c0_9], %13 {strides = array<i32>} : memref<8x128xf32, #tpu.memory_space<vmem>>, vector<8x128xf32>,
    return
  }
  func.func @transform_0(%arg0: i32, %arg1: i32) -> (i32, i32) {
    %c0_i32 = arith.constant 0 : i32
    %c0_i32_0 = arith.constant 0 : i32
    return %arg0, %c0_i32 : i32, i32
  }
  func.func @transform_1(%arg0: i32, %arg1: i32) -> (i32, i32) {
    %c0_i32 = arith.constant 0 : i32
    %c0_i32_0 = arith.constant 0 : i32
    return %c0_i32, %arg1 : i32, i32
  }
  func.func @transform_2(%arg0: i32, %arg1: i32) -> (i32, i32) {
    %c0_i32 = arith.constant 0 : i32
    %c0_i32_0 = arith.constant 0 : i32
    return %c0_i32, %arg1 : i32, i32
  }
  func.func @transform_3(%arg0: i32, %arg1: i32) -> (i32, i32) {
    %c0_i32 = arith.constant 0 : i32
    return %arg0, %arg1 : i32, i32
  }
}

</mosaic_0001>

<bundles_post_ra>
// kernel: tpu_custom_call.1
= control target key start
LH: loop header
LB: loop body
LE: loop exit
PB: predicated region body
PF: predicated region fallthrough
CT: control target
= control target key end

     0   :  { %8 = vsyncpa [#allocation3], 0  ;;  %s363_s0 = inlined_call_operand.hbm [shape: f32[8,64], index: 0, kind: input, shape index: {}]   ;;  %s364_s1 = inlined_call_operand.hbm [shape: f32[64,128], index: 1, kind: input, shape index: {}]   ;;  %s365_s2 = inlined_call_operand.vmem [shape: f32[3,128], index: 2, kind: input, shape index: {}]   ;;  %s366_s3 = inlined_call_operand.hbm [shape: f32[8,128], index: 3, kind: output, shape index: {}]  }
   0x1   :  { %9 = vsyncpa [#allocation6], 0 }
   0x2   :  { %10 = vsyncpa [#allocation4], 0  ;;  %s283_s12 = smov [#allocation2]   ;;  %s284_s14 = smov [#allocation5]  }
   0x3   :  { %s17_s13 = sshll.u32 %s283_s12, 4  ;;  %s26_s15 = sshll.u32 %s284_s14, 4  ;;  %s18_s13 = int_to_ptr.vmem [resolvable:$true] %s17_s13  ;;  %s311_s15 = int_to_ptr.vmem [resolvable:$true] %s26_s15 }
   0x4   :  { %s211_s18 = scalar_lea.hbm %s363_s0, 128 }
   0x5   :  { %p212_p0 = scmp.ne.s32.totalorder %s363_s0, %s211_s18  ;;  %p215_p1 = scmp.lt.u32.totalorder %s211_s18, %s363_s0 }
   0x7   :  { %p217_p2 = pnand %p215_p1, %p212_p0 }
   0x9   :  { %220 = shalt.err (!%p217_p2)
}
   0xa   :  { %s221_s23 = scalar_lea.vmem %s18_s13, 128  ;;  %p226_p4 = scmp.lt.s32.totalorder %s18_s13, %s18_s13 }
   0xb   :  { %p222_p3 = scmp.ne.s32.totalorder %s18_s13, %s221_s23  ;;  %p227_p5 = scmp.lt.s32.totalorder %s221_s23, %s221_s23 }
   0xd   :  { %p228_p6 = por %p227_p5, %p226_p4 }
   0xf   :  { %p229_p7 = pnand %p228_p6, %p222_p3 }
  0x11   :  { %232 = shalt.err (!%p229_p7)
}
  0x12   :  { %20 = dma.hbm_to_vmem [thread:$0]  %s363_s0, 128, %s18_s13, [#allocation3]  }
  0x13   :  { %s233_s28 = scalar_lea.hbm %s364_s1, 1024 }
  0x14   :  { %p234_p8 = scmp.ne.s32.totalorder %s364_s1, %s233_s28  ;;  %p237_p9 = scmp.lt.u32.totalorder %s233_s28, %s364_s1 }
  0x16   :  { %p239_p10 = pnand %p237_p9, %p234_p8 }
  0x18   :  { %242 = shalt.err (!%p239_p10)
}
  0x19   :  { %s243_s6 = scalar_lea.vmem %s311_s15, 1024  ;;  %p248_p12 = scmp.lt.s32.totalorder %s311_s15, %s311_s15 }
  0x1a   :  { %p244_p11 = scmp.ne.s32.totalorder %s311_s15, %s243_s6  ;;  %p249_p13 = scmp.lt.s32.totalorder %s243_s6, %s243_s6 }
  0x1c   :  { %p250_p0 = por %p249_p13, %p248_p12 }
  0x1e   :  { %p251_p1 = pnand %p250_p0, %p244_p11 }
  0x20   :  { %254 = shalt.err (!%p251_p1)
}
  0x21   :  { %s285_s0 = smov 128   ;;  %s286_s7 = smov 8  }
  0x22   :  { %32 = dma.hbm_to_vmem [thread:$0]  %s364_s1, 1024, %s311_s15, [#allocation6], %s285_s0, %s285_s0, %s286_s7  }
  0x23   :  { %277 = dma.done.wait [#allocation3], 128  }
  0x24   :  { %278 = vsyncadd [#allocation3], 4294967168 }
  0x25   :  { %279 = dma.done.wait [#allocation6], 1024  }
  0x26   :  { %280 = vsyncadd [#allocation6], 4294966272  ;;  %v287_v0 = vmov 0.0|0.0   ;;  %vm288_vm0 = vmmov 0   ;;  %v289_v1 = vmov 0.0   ;;  %v42_v2 = vld [vmem:[#allocation5] sm:$0xff] }
  0x27   :  { %191 = vmatprep.subr.bf16.mxu0 %v287_v0  ;;  %188 = vmatprep.mubr.msk.f32.mxu0 %vm288_vm0, %v289_v1  ;;  %v43_v3 = vld [vmem:[#allocation5 + $0x8] sm:$0xff]  ;;  %v44_v4 = vld [vmem:[#allocation5 + $0x10] sm:$0xff]  ;;  %v45_v6 = vld [vmem:[#allocation5 + $0x18] sm:$0xff]  ;;  %vm55_vm1 = vcmask 523264   ;;  %s290_s15 = smov [#allocation7]  }
  0x28   :  { %v192_v5 = vpack.c.bf16 %v43_v3, %v42_v2  ;;  %v195_v7 = vpack.c.bf16 %v45_v6, %v44_v4  ;;  %v46_v8 = vld [vmem:[#allocation5 + $0x20] sm:$0xff]  ;;  %v47_v9 = vld [vmem:[#allocation5 + $0x28] sm:$0xff]  ;;  %v48_v11 = vld [vmem:[#allocation5 + $0x30] sm:$0xff]  ;;  %s149_s16 = sshll.u32 %s290_s15, 4  ;;  %s150_s16 = int_to_ptr.vmem [resolvable:$true] %s149_s16 }
  0x29   :  { %v198_v10 = vpack.c.bf16 %v47_v9, %v46_v8  ;;  %v49_v12 = vld [vmem:[#allocation5 + $0x38] sm:$0xff]  ;;  %s255_s17 = scalar_lea.vmem %s150_s16, 128  ;;  %p260_p3 = scmp.lt.s32.totalorder %s150_s16, %s150_s16 }
  0x2a   :  { %193 = vmatpush3.bf16.msra.mxu0 %v192_v5  ;;  %v201_v13 = vpack.c.bf16 %v49_v12, %v48_v11  ;;  %v41_v14 = vld [vmem:[#allocation2] sm:$0xff]  ;;  %p256_p2 = scmp.ne.s32.totalorder %s150_s16, %s255_s17  ;;  %p261_p4 = scmp.lt.s32.totalorder %s255_s17, %s255_s17 }
  0x2b   :  { %194 = vmatprep.subr.bf16.mxu0 %v287_v0  ;;  %v159_v15 = vld [vmem:[%s365_s2] ss:$0 sm:$0xff]  ;;  %v161_v19 = vld [vmem:[%s365_s2 + $0x1] ss:$0 sm:$0xff]  ;;  %v162_v21 = vld [vmem:[%s365_s2 + $0x2] ss:$0 sm:$0xff] }
  0x2c   :  { %p262_p5 = por %p261_p4, %p260_p3 }
  0x2e   :  { %196 = vmatpush3.bf16.msra.mxu0 %v195_v7  ;;  %p263_p6 = pnand %p262_p5, %p256_p2 }
  0x2f   :  { %197 = vmatprep.subr.bf16.mxu0 %v287_v0 }
  0x32   :  { %199 = vmatpush3.bf16.msra.mxu0 %v198_v10 }
  0x33   :  { %200 = vmatprep.subr.bf16.mxu0 %v287_v0 }
  0x36   :  { %202 = vmatpush3.bf16.msra.mxu0 %v201_v13 }
  0x39   :  { %189 = vmatmul.mubr.msk.f32.vlgmr.msra.gmra.mrb[0].mxu0 %vm55_vm1, %v41_v14 }
 0x10c   :  { %v125_v16 = vpop.f32.mrb[0].mxu0 }
 0x10d   :  { %v126_v17 = vadd.f32 %v159_v15, %v125_v16  ;;  %v190_v18 = vpop.f32.mrb[1].mxu0 }
 0x10f   :  { %v129_v20 = vmax.f32 %v126_v17, 0.0 }
 0x111   :  { %v135_v22 = vmul.f32 %v161_v19, %v129_v20 }
 0x113   :  { %v141_v23 = vadd.f32 %v162_v21, %v135_v22 }
 0x115   :  { %142 = vst [vmem:[#allocation7] sm:$0xff] %v141_v23 }
 0x116   :  { %266 = shalt.err (!%p263_p6)
}
 0x117   :  { %s267_s20 = scalar_lea.hbm %s366_s3, 128 }
 0x118   :  { %p268_p7 = scmp.ne.s32.totalorder %s366_s3, %s267_s20  ;;  %p271_p8 = scmp.lt.u32.totalorder %s267_s20, %s366_s3 }
 0x11a   :  { %p273_p9 = pnand %p271_p8, %p268_p7 }
 0x11c   :  { %276 = shalt.err (!%p273_p9)
}
 0x11d   :  { %152 = dma.vmem_to_hbm [thread:$0]  %s150_s16, 128, %s366_s3, [#allocation4]  }
 0x11e   :  { %281 = dma.done.wait [#allocation4], 128  }
 0x11f   :  { %282 = vsyncadd [#allocation4], 4294967168 }
 0x120   :  { %156 = vsyncpa [#allocation3], 1 }
 0x121   :  { %157 = vsyncpa [#allocation6], 1 }
 0x122   :  { %158 = vsyncpa [#allocation4], 1 }

</bundles_post_ra>
